<compile_context>
chip_gen: v7x
topology: tpu7x:2x2x1
jax: 0.10.0
libtpu: 0.0.40
codegen_flags: <defaults>
</compile_context>

<pallas_src>
import functools

import jax
import jax.numpy as jnp
from jax.experimental import pallas as pl
from jax.experimental.pallas import tpu as pltpu

_LANES = 1024    # lane-dense last dim (multiple of 128); 512x1024 f32 = 2 MiB tile
_ROW_CAP = 512   # max sublane rows per tile


def _bce_mean_kernel(*refs, block_rows, steps, lanes, n_valid,
                     pos_weight, has_mask):
    if has_mask:
        x_ref, t_ref, m_ref, out_ref, acc_ref = refs
    else:
        x_ref, t_ref, out_ref, acc_ref = refs
        m_ref = None

    c = pl.program_id(0)   # parallel split (megacore on v7x)
    i = pl.program_id(1)   # reduction step within this split

    @pl.when(i == 0)
    def _():
        acc_ref[...] = jnp.zeros_like(acc_ref)

    # Cast on load: operands may arrive as f32 / bf16 / int8 / bool.
    x = x_ref[...].astype(jnp.float32)          # (block_rows, lanes)
    t = t_ref[...].astype(jnp.float32)

    # Numerically stable BCE-with-logits, all math in f32 (v5e has no bf16 VPU).
    bce = jnp.maximum(x, 0.0) - x * t + jnp.log1p(jnp.exp(-jnp.abs(x)))

    # Fuse mask and pos_weight into one multiplicative scale (single multiply
    # into bce). Exact `t == 1.0` semantics kept (matches the torch module even
    # for soft targets).
    if pos_weight is not None:
        w = jnp.where(t == 1.0, jnp.float32(pos_weight), jnp.float32(1.0))
        if m_ref is not None:
            w = w * m_ref[...].astype(jnp.float32)
        bce = bce * w
    elif m_ref is not None:
        bce = bce * m_ref[...].astype(jnp.float32)

    # --- validity handling (only the tail blocks pay for it) ----------------
    full_rows = n_valid // lanes        # static: rows that are fully valid
    rem = n_valid % lanes               # static: valid cols in the partial row
    base_row = (c * steps + i) * block_rows          # scalar (row index, no
    needs_mask = base_row + block_rows > full_rows   #  int32 overflow risk)

    @pl.when(needs_mask)
    def _():
        row_i = base_row + jax.lax.broadcasted_iota(jnp.int32, bce.shape, 0)
        valid = row_i < full_rows
        if rem:
            col_i = jax.lax.broadcasted_iota(jnp.int32, bce.shape, 1)
            valid = valid | ((row_i == full_rows) & (col_i < rem))
        # select (not multiply): OOB lanes may hold garbage / NaN.
        acc_ref[...] += jnp.where(valid, bce, 0.0)

    @pl.when(jnp.logical_not(needs_mask))
    def _():
        acc_ref[...] += bce

    # Single finalize per split: one cross-lane (XLU) reduce.
    @pl.when(i == steps - 1)
    def _():
        out_ref[...] = jnp.full(out_ref.shape, jnp.sum(acc_ref[...]),
                                dtype=jnp.float32)


def bce_with_logits_mean(inputs, targets, reduction='mean', mask=None,
                         batch_index=None, pos_weight=None,
                         lanes=_LANES, row_cap=_ROW_CAP):
    # `reduction` and `batch_index` accepted for signature parity with the torch
    # forward but unused there (it always returns .mean()).
    del reduction, batch_index

    n = int(inputs.size)
    has_mask = mask is not None
    assert lanes % 128 == 0 and row_cap % 8 == 0

    def prep(v):
        # Flatten (free reshape, no host dtype cast). Only if numel is not a
        # multiple of `lanes` do we pay one small tail pad (< lanes zeros).
        v = v.reshape(-1)
        rem = n % lanes
        if rem:
            v = jnp.pad(v, (0, lanes - rem))
        return v.reshape(-1, lanes)

    operands = [prep(inputs), prep(targets)]
    if has_mask:
        operands.append(prep(mask))

    rows = operands[0].shape[0]
    block_rows = rows if rows < row_cap else row_cap   # full dim or multiple of 8
    total_blocks = pl.cdiv(rows, block_rows)
    num_splits = 2 if total_blocks >= 2 else 1         # engage both v7x cores
    steps = pl.cdiv(total_blocks, num_splits)

    if num_splits * steps == total_blocks:
        def in_map(c, i):
            return (c * steps + i, 0)
    else:
        # Odd block count: clamp the (single) fully-OOB step onto the last valid
        # block; the in-kernel validity mask zeroes its contribution.
        def in_map(c, i):
            return (jnp.minimum(c * steps + i, total_blocks - 1), 0)

    kernel = functools.partial(
        _bce_mean_kernel, block_rows=block_rows, steps=steps, lanes=lanes,
        n_valid=n, pos_weight=pos_weight, has_mask=has_mask)

    partials = pl.pallas_call(
        kernel,
        out_shape=jax.ShapeDtypeStruct((num_splits, 8, 128), jnp.float32),
        grid=(num_splits, steps),
        in_specs=[pl.BlockSpec((block_rows, lanes), in_map) for _ in operands],
        out_specs=pl.BlockSpec((1, 8, 128), lambda c, i: (c, 0, 0)),
        scratch_shapes=[pltpu.VMEM((block_rows, lanes), jnp.float32)],
        compiler_params=pltpu.CompilerParams(
            dimension_semantics=("parallel", "arbitrary"),
            vmem_limit_bytes=32 * 1024 * 1024),
    )(*operands)

    # Combine the per-core partial sums and normalize by the TRUE element count.
    return jnp.sum(partials[:, 0, 0]) * (1.0 / n)


class BCELossWithLogits:
    """Pallas-TPU equivalent of the torch BCELossWtihLogits module."""

    def __init__(self, pos_weight=None):
        self.pos_weight = pos_weight

    def __call__(self, inputs, targets, reduction, mask=None, batch_index=None,
                 **tile_kwargs):
        return bce_with_logits_mean(inputs, targets, reduction, mask=mask,
                                    batch_index=batch_index,
                                    pos_weight=self.pos_weight, **tile_kwargs)


BCELossWtihLogits = BCELossWithLogits  # alias matching the original spelling


# ---------------------------------------------------------------------------
if __name__ == "__main__":
    key = jax.random.PRNGKey(0)

    def ref(x, t, m, pw):
        x = x.astype(jnp.float32)
        t = t.astype(jnp.float32)
        bce = jnp.maximum(x, 0.0) - x * t + jnp.log1p(jnp.exp(-jnp.abs(x)))
        if m is not None:
            bce = bce * m.astype(jnp.float32)
        if pw is not None:
            bce = jnp.where(t == 1.0, bce * pw, bce)
        return jnp.mean(bce)

    def check(got, want):
        got = jax.block_until_ready(got)
        assert jnp.allclose(got, want, atol=1e-5, rtol=1e-5), (got, want)

    # case 1: (2,4,16,16), bf16 targets/mask (narrow HBM dtype), no pos_weight
    B, C, H, W = 2, 4, 16, 16
    k1, k2, k3 = jax.random.split(key, 3)
    logits = jax.random.normal(k1, (B, C, H, W), jnp.float32)
    targets = (jax.random.uniform(k2, (B, C, H, W)) > 0.5).astype(jnp.bfloat16)
    mask = (jax.random.uniform(k3, (B, C, H, W)) > 0.2).astype(jnp.bfloat16)
    check(BCELossWithLogits()(logits, targets, 'mean', mask=mask),
          ref(logits, targets, mask, None))

    # case 2: pos_weight, no mask, f32 everything
    t32 = targets.astype(jnp.float32)
    check(BCELossWithLogits(pos_weight=2.0)(logits, t32, 'mean'),
          ref(logits, t32, None, 2.0))

    # case 3: ragged size (numel not a multiple of lanes) + mask + pos_weight
    k4, k5, k6 = jax.random.split(jax.random.PRNGKey(1), 3)
    lg3 = jax.random.normal(k4, (2, 3, 17, 9), jnp.float32)
    tg3 = (jax.random.uniform(k5, (2, 3, 17, 9)) > 0.5).astype(jnp.float32)
    mk3 = (jax.random.uniform(k6, (2, 3, 17, 9)) > 0.3).astype(jnp.float32)
    check(BCELossWithLogits(pos_weight=0.5)(lg3, tg3, 'mean', mask=mk3),
          ref(lg3, tg3, mk3, 0.5))

    # case 4: small tiles to exercise the multi-block, two-split (megacore) path
    check(BCELossWithLogits()(logits, t32, 'mean', mask=mask.astype(jnp.float32),
                              lanes=128, row_cap=8),
          ref(logits, t32, mask.astype(jnp.float32), None))

    # case 5: odd block count -> clamped duplicate block + ragged last block
    k7, k8, k9 = jax.random.split(jax.random.PRNGKey(2), 3)
    lg5 = jax.random.normal(k7, (1, 1, 48, 52), jnp.float32)
    tg5 = (jax.random.uniform(k8, (1, 1, 48, 52)) > 0.5).astype(jnp.float32)
    mk5 = (jax.random.uniform(k9, (1, 1, 48, 52)) > 0.1).astype(jnp.float32)
    check(BCELossWithLogits(pos_weight=3.0)(lg5, tg5, 'mean', mask=mk5,
                                            lanes=128, row_cap=8),
          ref(lg5, tg5, mk5, 3.0))

    print("KERNEL_OK")
</pallas_src>

<mosaic_0001>
module attributes {stable_mosaic.version = 11 : i64} {
  func.func @_bce_mean_kernel(%arg0: i32, %arg1: i32, %arg2: memref<2x1024xf32, #tpu.memory_space<vmem>>, %arg3: memref<2x1024xbf16, #tpu.memory_space<vmem>>, %arg4: memref<2x1024xbf16, #tpu.memory_space<vmem>>, %arg5: memref<1x8x128xf32, #tpu.memory_space<vmem>>, %arg6: memref<2x1024xf32, #tpu.memory_space<vmem>>) attributes {dimension_semantics = [#tpu.dimension_semantics<parallel>, #tpu.dimension_semantics<arbitrary>], iteration_bounds = array<i64: 1, 1>, scalar_prefetch = 0 : i64, scratch_operands = 1 : i64, tpu.core_type = #tpu.core_type<tc>, window_params = [{transform_indices = @transform_0, window_bounds = array<i64: 2, 1024>}, {transform_indices = @transform_1, window_bounds = array<i64: 2, 1024>}, {transform_indices = @transform_2, window_bounds = array<i64: 2, 1024>}, {transform_indices = @transform_3, window_bounds = array<i64: 1, 8, 128>}]} {
    %c0_i32 = arith.constant 0 : i32
    %0 = arith.cmpi eq, %arg1, %c0_i32 : i32
    %1 = arith.extui %0 : i1 to i32
    %c0_i32_0 = arith.constant 0 : i32
    %2 = arith.cmpi ne, %1, %c0_i32_0 : i32
    scf.if %2 {
      %cst_13 = arith.constant 0.000000e+00 : f32
      %32 = vector.broadcast %cst_13 : f32 to vector<2x1024xf32>
      %c0_14 = arith.constant 0 : index
      %c0_15 = arith.constant 0 : index
      %33 = vector.load %arg6[%c0_14, %c0_15] : memref<2x1024xf32, #tpu.memory_space<vmem>>, vector<2x1024xf32>
      tpu.vector_store %arg6[%c0_14, %c0_15], %32 {strides = array<i32>} : memref<2x1024xf32, #tpu.memory_space<vmem>>, vector<2x1024xf32>,
    } else {
    }
    %c0 = arith.constant 0 : index
    %c0_1 = arith.constant 0 : index
    %3 = vector.load %arg2[%c0, %c0_1] : memref<2x1024xf32, #tpu.memory_space<vmem>>, vector<2x1024xf32>
    %c0_2 = arith.constant 0 : index
    %c0_3 = arith.constant 0 : index
    %4 = vector.load %arg3[%c0_2, %c0_3] : memref<2x1024xbf16, #tpu.memory_space<vmem>>, vector<2x1024xbf16>
    %5 = arith.extf %4 : vector<2x1024xbf16> to vector<2x1024xf32>
    %cst = arith.constant 0.000000e+00 : f32
    %6 = vector.broadcast %cst : f32 to vector<2x1024xf32>
    %7 = arith.maximumf %3, %6 : vector<2x1024xf32>
    %8 = arith.mulf %3, %5 : vector<2x1024xf32>
    %9 = arith.subf %7, %8 : vector<2x1024xf32>
    %10 = math.absf %3 : vector<2x1024xf32>
    %cst_4 = arith.constant 0.000000e+00 : f32
    %11 = vector.broadcast %cst_4 : f32 to vector<2x1024xf32>
    %12 = arith.subf %11, %10 : vector<2x1024xf32>
    %13 = math.exp %12 : vector<2x1024xf32>
    %14 = math.log1p %13 : vector<2x1024xf32>
    %15 = arith.addf %9, %14 : vector<2x1024xf32>
    %c0_5 = arith.constant 0 : index
    %c0_6 = arith.constant 0 : index
    %16 = vector.load %arg4[%c0_5, %c0_6] : memref<2x1024xbf16, #tpu.memory_space<vmem>>, vector<2x1024xbf16>
    %17 = arith.extf %16 : vector<2x1024xbf16> to vector<2x1024xf32>
    %18 = arith.mulf %15, %17 : vector<2x1024xf32>
    %c1_i32 = arith.constant 1 : i32
    %19 = arith.muli %arg0, %c1_i32 : i32
    %20 = arith.addi %19, %arg1 : i32
    %c2_i32 = arith.constant 2 : i32
    %21 = arith.muli %20, %c2_i32 : i32
    %c2_i32_7 = arith.constant 2 : i32
    %22 = arith.addi %21, %c2_i32_7 : i32
    %c2_i32_8 = arith.constant 2 : i32
    %23 = arith.cmpi sgt, %22, %c2_i32_8 : i32
    %24 = arith.extui %23 : i1 to i32
    %c0_i32_9 = arith.constant 0 : i32
    %25 = arith.cmpi ne, %24, %c0_i32_9 : i32
    scf.if %25 {
      %32 = tpu.iota {dimensions = array<i32: 0>} : vector<2x1024xi32>
      %33 = vector.broadcast %21 : i32 to vector<2x1024xi32>
      %34 = arith.addi %33, %32 : vector<2x1024xi32>
      %c2_i32_13 = arith.constant 2 : i32
      %35 = vector.broadcast %c2_i32_13 : i32 to vector<2x1024xi32>
      %36 = arith.cmpi slt, %34, %35 : vector<2x1024xi32>
      %c0_14 = arith.constant 0 : index
      %c0_15 = arith.constant 0 : index
      %37 = vector.load %arg6[%c0_14, %c0_15] : memref<2x1024xf32, #tpu.memory_space<vmem>>, vector<2x1024xf32>
      %cst_16 = arith.constant 0.000000e+00 : f32
      %38 = vector.broadcast %cst_16 : f32 to vector<2x1024xf32>
      %39 = arith.select %36, %18, %38 : vector<2x1024xi1>, vector<2x1024xf32>
      %40 = arith.addf %37, %39 : vector<2x1024xf32>
      %c0_17 = arith.constant 0 : index
      %c0_18 = arith.constant 0 : index
      %41 = vector.load %arg6[%c0_17, %c0_18] : memref<2x1024xf32, #tpu.memory_space<vmem>>, vector<2x1024xf32>
      tpu.vector_store %arg6[%c0_17, %c0_18], %40 {strides = array<i32>} : memref<2x1024xf32, #tpu.memory_space<vmem>>, vector<2x1024xf32>,
    } else {
    }
    %true = arith.constant true
    %26 = arith.xori %23, %true : i1
    %27 = arith.extui %26 : i1 to i32
    %c0_i32_10 = arith.constant 0 : i32
    %28 = arith.cmpi ne, %27, %c0_i32_10 : i32
    scf.if %28 {
      %c0_13 = arith.constant 0 : index
      %c0_14 = arith.constant 0 : index
      %32 = vector.load %arg6[%c0_13, %c0_14] : memref<2x1024xf32, #tpu.memory_space<vmem>>, vector<2x1024xf32>
      %33 = arith.addf %32, %18 : vector<2x1024xf32>
      %c0_15 = arith.constant 0 : index
      %c0_16 = arith.constant 0 : index
      %34 = vector.load %arg6[%c0_15, %c0_16] : memref<2x1024xf32, #tpu.memory_space<vmem>>, vector<2x1024xf32>
      tpu.vector_store %arg6[%c0_15, %c0_16], %33 {strides = array<i32>} : memref<2x1024xf32, #tpu.memory_space<vmem>>, vector<2x1024xf32>,
    } else {
    }
    %c0_i32_11 = arith.constant 0 : i32
    %29 = arith.cmpi eq, %arg1, %c0_i32_11 : i32
    %30 = arith.extui %29 : i1 to i32
    %c0_i32_12 = arith.constant 0 : i32
    %31 = arith.cmpi ne, %30, %c0_i32_12 : i32
    scf.if %31 {
      %c0_13 = arith.constant 0 : index
      %c0_14 = arith.constant 0 : index
      %32 = vector.load %arg6[%c0_13, %c0_14] : memref<2x1024xf32, #tpu.memory_space<vmem>>, vector<2x1024xf32>
      %33 = vector.shape_cast %32 : vector<2x1024xf32> to vector<1x2x1024xf32>
      %cst_15 = arith.constant dense<0.000000e+00> : vector<1xf32>
      %34 = vector.multi_reduction <add>, %33, %cst_15 [1, 2] : vector<1x2x1024xf32> to vector<1xf32>
      %35 = vector.shape_cast %34 : vector<1xf32> to vector<1x1x1xf32>
      %36 = vector.extract %35[0, 0, 0] : f32 from vector<1x1x1xf32>
      %37 = vector.broadcast %36 : f32 to vector<1x8x128xf32>
      %c0_16 = arith.constant 0 : index
      %c0_17 = arith.constant 0 : index
      %c0_18 = arith.constant 0 : index
      %38 = vector.load %arg5[%c0_16, %c0_17, %c0_18] : memref<1x8x128xf32, #tpu.memory_space<vmem>>, vector<1x8x128xf32>
      tpu.vector_store %arg5[%c0_16, %c0_17, %c0_18], %37 {strides = array<i32>} : memref<1x8x128xf32, #tpu.memory_space<vmem>>, vector<1x8x128xf32>,
    } else {
    }
    return
  }
  func.func @transform_0(%arg0: i32, %arg1: i32) -> (i32, i32) {
    %c1_i32 = arith.constant 1 : i32
    %0 = arith.muli %arg0, %c1_i32 : i32
    %1 = arith.addi %0, %arg1 : i32
    %c0_i32 = arith.constant 0 : i32
    %c0_i32_0 = arith.constant 0 : i32
    return %1, %c0_i32 : i32, i32
  }
  func.func @transform_1(%arg0: i32, %arg1: i32) -> (i32, i32) {
    %c1_i32 = arith.constant 1 : i32
    %0 = arith.muli %arg0, %c1_i32 : i32
    %1 = arith.addi %0, %arg1 : i32
    %c0_i32 = arith.constant 0 : i32
    %c0_i32_0 = arith.constant 0 : i32
    return %1, %c0_i32 : i32, i32
  }
  func.func @transform_2(%arg0: i32, %arg1: i32) -> (i32, i32) {
    %c1_i32 = arith.constant 1 : i32
    %0 = arith.muli %arg0, %c1_i32 : i32
    %1 = arith.addi %0, %arg1 : i32
    %c0_i32 = arith.constant 0 : i32
    %c0_i32_0 = arith.constant 0 : i32
    return %1, %c0_i32 : i32, i32
  }
  func.func @transform_3(%arg0: i32, %arg1: i32) -> (i32, i32, i32) {
    %c0_i32 = arith.constant 0 : i32
    %c0_i32_0 = arith.constant 0 : i32
    %c0_i32_1 = arith.constant 0 : i32
    return %arg0, %c0_i32, %c0_i32_0 : i32, i32, i32
  }
}

</mosaic_0001>

<bundles_post_ra>
// kernel: tpu_custom_call.1
= control target key start
LH: loop header
LB: loop body
LE: loop exit
PB: predicated region body
PF: predicated region fallthrough
CT: control target
= control target key end

     0   :  { %8 = vsyncpa [#allocation4], 0  ;;  %s521_s0 = inlined_call_operand.hbm [shape: f32[2,1024], index: 0, kind: input, shape index: {}]   ;;  %s522_s1 = inlined_call_operand.hbm [shape: bf16[2,1024], index: 1, kind: input, shape index: {}]   ;;  %s523_s2 = inlined_call_operand.hbm [shape: bf16[2,1024], index: 2, kind: input, shape index: {}]   ;;  %s524_s3 = inlined_call_operand.hbm [shape: f32[1,8,128], index: 3, kind: output, shape index: {}]  }
   0x1   :  { %9 = vsyncpa [#allocation7], 0 }
   0x2   :  { %10 = vsyncpa [#allocation5], 0  ;;  %s440_s12 = smov [#allocation6]   ;;  %s441_s14 = smov [#allocation3]  }
   0x3   :  { %s35_s13 = sshll.u32 %s440_s12, 4  ;;  %s21_s15 = sshll.u32 %s441_s14, 4  ;;  %s36_s13 = int_to_ptr.vmem [resolvable:$true] %s35_s13  ;;  %s22_s15 = int_to_ptr.vmem [resolvable:$true] %s21_s15 }
   0x4   :  { %s346_s18 = scalar_lea.hbm %s522_s1, 128 }
   0x5   :  { %p347_p0 = scmp.ne.s32.totalorder %s522_s1, %s346_s18  ;;  %p350_p1 = scmp.lt.u32.totalorder %s346_s18, %s522_s1 }
   0x7   :  { %p352_p2 = pnand %p350_p1, %p347_p0 }
   0x9   :  { %355 = shalt.err (!%p352_p2)
}
   0xa   :  { %s356_s23 = scalar_lea.vmem %s36_s13, 128  ;;  %p361_p4 = scmp.lt.s32.totalorder %s36_s13, %s36_s13 }
   0xb   :  { %p357_p3 = scmp.ne.s32.totalorder %s36_s13, %s356_s23  ;;  %p362_p5 = scmp.lt.s32.totalorder %s356_s23, %s356_s23 }
   0xd   :  { %p363_p6 = por %p362_p5, %p361_p4 }
   0xf   :  { %p364_p7 = pnand %p363_p6, %p357_p3 }
  0x11   :  { %367 = shalt.err (!%p364_p7)
}
  0x12   :  { %38 = dma.hbm_to_vmem [thread:$0]  %s522_s1, 128, %s36_s13, [#allocation7]  }
  0x13   :  { %s368_s28 = scalar_lea.hbm %s521_s0, 256 }
  0x14   :  { %p369_p8 = scmp.ne.s32.totalorder %s521_s0, %s368_s28  ;;  %p372_p9 = scmp.lt.u32.totalorder %s368_s28, %s521_s0 }
  0x16   :  { %p374_p10 = pnand %p372_p9, %p369_p8 }
  0x18   :  { %377 = shalt.err (!%p374_p10)
}
  0x19   :  { %s378_s6 = scalar_lea.vmem %s22_s15, 256  ;;  %p383_p12 = scmp.lt.s32.totalorder %s22_s15, %s22_s15 }
  0x1a   :  { %p379_p11 = scmp.ne.s32.totalorder %s22_s15, %s378_s6  ;;  %p384_p13 = scmp.lt.s32.totalorder %s378_s6, %s378_s6 }
  0x1c   :  { %p385_p0 = por %p384_p13, %p383_p12 }
  0x1e   :  { %p386_p1 = pnand %p385_p0, %p379_p11 }
  0x20   :  { %389 = shalt.err (!%p386_p1)
}
  0x21   :  { %24 = dma.hbm_to_vmem [thread:$0]  %s521_s0, 256, %s22_s15, [#allocation4]  }
  0x22   :  { %s442_s8 = smov [#allocation8]   ;;  %s390_s12 = scalar_lea.hbm %s523_s2, 128 }
  0x23   :  { %s49_s9 = sshll.u32 %s442_s8, 4  ;;  %p391_p2 = scmp.ne.s32.totalorder %s523_s2, %s390_s12  ;;  %s50_s9 = int_to_ptr.vmem [resolvable:$true] %s49_s9 }
  0x24   :  { %p394_p3 = scmp.lt.u32.totalorder %s390_s12, %s523_s2 }
  0x26   :  { %p396_p4 = pnand %p394_p3, %p391_p2 }
  0x28   :  { %399 = shalt.err (!%p396_p4)
}
  0x29   :  { %s400_s18 = scalar_lea.vmem %s50_s9, 128  ;;  %p405_p6 = scmp.lt.s32.totalorder %s50_s9, %s50_s9 }
  0x2a   :  { %p401_p5 = scmp.ne.s32.totalorder %s50_s9, %s400_s18  ;;  %p406_p7 = scmp.lt.s32.totalorder %s400_s18, %s400_s18 }
  0x2c   :  { %p407_p8 = por %p406_p7, %p405_p6 }
  0x2e   :  { %p408_p9 = pnand %p407_p8, %p401_p5 }
  0x30   :  { %411 = shalt.err (!%p408_p9)
}
  0x31   :  { %52 = dma.hbm_to_vmem [thread:$0]  %s523_s2, 128, %s50_s9, [#allocation7]  }
  0x32   :  { %434 = dma.done.wait [#allocation4], 256  }
  0x33   :  { %435 = vsyncadd [#allocation4], 4294967040 }
  0x34   :  { %436 = dma.done.wait [#allocation7], 256  }
  0x35   :  { %437 = vsyncadd [#allocation7], 4294967040  ;;  %v71_v0 = vld [vmem:[#allocation3] sm:$0xff]  ;;  %v72_v1 = vld [vmem:[#allocation3 + $0x8] sm:$0xff]  ;;  %v443_v18 = vmov 1983009808   ;;  %v250_v20 = vlaneseq }
  0x36   :  { %v82_v2 = vand.u32 2147483647, %v71_v0  ;;  %v83_v3 = vand.u32 2147483647, %v72_v1  ;;  %v73_v11 = vld [vmem:[#allocation6] sm:$0xff]  ;;  %v248_v19 = vunpack.c.l.s4 %v443_v18  ;;  %v76_v21 = vmax.f32 %v71_v0, 0.0 }
  0x37   :  { %v74_v14 = vunpack.c.l.bf16 %v73_v11  ;;  %v75_v16 = vunpack.c.h.bf16 %v73_v11  ;;  %v77_v25 = vmax.f32 %v72_v1, 0.0  ;;  %v110_v29 = vld [vmem:[#allocation8] sm:$0xff]  ;;  %v251_v30 = vshrl.u32 %v250_v20, 7  ;;  %s444_s2 = smov [#allocation9]  }
  0x38   :  { %v84_v4 = vsub.f32 0.0, %v82_v2  ;;  %v85_v5 = vsub.f32 0.0, %v83_v3  ;;  %v249_v34 = vunpack.c.0.s8 %v248_v19  ;;  %v111_v39 = vunpack.c.l.bf16 %v110_v29  ;;  %s321_s19 = sshll.u32 %s444_s2, 4  ;;  %s322_s19 = int_to_ptr.vmem [resolvable:$true] %s321_s19 }
  0x39   :  { %v78_v22 = vmul.f32 %v74_v14, %v71_v0  ;;  %v79_v26 = vmul.f32 %v75_v16, %v72_v1  ;;  %v112_v41 = vunpack.c.h.bf16 %v110_v29  ;;  %vm288_vm2 = vcmask 1041408   ;;  %s412_s21 = scalar_lea.vmem %s322_s19, 128  ;;  %p417_p11 = scmp.lt.s32.totalorder %s322_s19, %s322_s19 }
  0x3a   :  { %v86_v6 = vmul.f32 1.442695, %v84_v4  ;;  %v88_v7 = vmul.f32 1.442695, %v85_v5  ;;  %v252_v44 = vsub.s32 %v249_v34, %v251_v30  ;;  %p413_p10 = scmp.ne.s32.totalorder %s322_s19, %s412_s21  ;;  %p418_p12 = scmp.lt.s32.totalorder %s412_s21, %s412_s21 }
  0x3b   :  { %v80_v32 = vsub.f32 %v76_v21, %v78_v22  ;;  %v81_v36 = vsub.f32 %v77_v25, %v79_v26 }
  0x3c   :  { %338 = vpow2.f32 %v86_v6  ;;  %p419_p13 = por %p418_p12, %p417_p11 }
  0x3d   :  { %340 = vpow2.f32 %v88_v7 }
  0x3e   :  { %p420_p0 = pnand %p419_p13, %p413_p10 }
  0x46   :  { %v339_v8 = vpop.eup %338 }
  0x47   :  { %v341_v9 = vpop.eup %340  ;;  %v90_v10 = vadd.f32 1.0, %v339_v8  ;;  %v93_v13 = vmul.f32 -0.5, %v339_v8  ;;  %v96_v23 = vand.u32 2147483647, %v339_v8 }
  0x48   :  { %v99_v12 = vadd.f32 1.0, %v341_v9  ;;  %v102_v15 = vmul.f32 -0.5, %v341_v9  ;;  %v105_v27 = vand.u32 2147483647, %v341_v9 }
  0x49   :  { %342 = vlog2.f32 %v90_v10  ;;  %v94_v17 = vadd.f32 1.0, %v93_v13  ;;  %vm97_vm0 = vcmp.lt.f32.partialorder %v96_v23, 0.0004427343 }
  0x4a   :  { %344 = vlog2.f32 %v99_v12  ;;  %v103_v24 = vadd.f32 1.0, %v102_v15  ;;  %vm106_vm1 = vcmp.lt.f32.partialorder %v105_v27, 0.0004427343 }
  0x4b   :  { %v95_v28 = vmul.f32 %v339_v8, %v94_v17 }
  0x4c   :  { %v104_v33 = vmul.f32 %v341_v9, %v103_v24 }
  0x53   :  { %v343_v31 = vpop.eup %342 }
  0x54   :  { %v345_v35 = vpop.eup %344  ;;  %v92_v37 = vmul.f32 0.6931472, %v343_v31 }
  0x55   :  { %v101_v38 = vmul.f32 0.6931472, %v345_v35 }
  0x56   :  { %v98_v40 = vsel %vm97_vm0, %v95_v28, %v92_v37 }
  0x57   :  { %v107_v42 = vsel %vm106_vm1, %v104_v33, %v101_v38  ;;  %v108_v43 = vadd.f32 %v98_v40, %v80_v32 }
  0x58   :  { %v109_v45 = vadd.f32 %v107_v42, %v81_v36 }
  0x59   :  { %v113_v46 = vmul.f32 %v111_v39, %v108_v43 }
  0x5a   :  { %v114_v47 = vmul.f32 %v112_v41, %v109_v45 }
  0x5b   :  { %v246_v48 = vcombine.high %v113_v46, %v113_v46  ;;  %v253_v49 = vrot.slane %v113_v46, %v252_v44 }
  0x5c   :  { %v263_v50 = vcombine.high %v114_v47, %v114_v47  ;;  %v270_v53 = vrot.slane %v114_v47, %v252_v44 }
  0x5d   :  { %v260_v51 = vrot.slane %v246_v48, %v252_v44  ;;  %v261_v52 = vcombine.high %v253_v49, %v253_v49  ;;  %v289_v54 = vsel %vm288_vm2, %v253_v49, 0.0 }
  0x5e   :  { %v277_v59 = vrot.slane %v263_v50, %v252_v44  ;;  %v278_v60 = vcombine.high %v270_v53, %v270_v53  ;;  %v296_v63 = vsel %vm288_vm2, %v270_v53, 0.0 }
  0x5f   :  { %v262_v55 = vcombine.high %v260_v51, %v260_v51  ;;  %v290_v56 = vsel %vm288_vm2, %v261_v52, 0.0  ;;  %v292_v57 = vsel %vm288_vm2, %v260_v51, 0.0 }
  0x60   :  { %v291_v58 = vadd.f32 %v290_v56, %v289_v54  ;;  %v279_v1 = vcombine.high %v277_v59, %v277_v59  ;;  %v298_v2 = vsel %vm288_vm2, %v278_v60, 0.0  ;;  %v300_v4 = vsel %vm288_vm2, %v277_v59, 0.0 }
  0x61   :  { %v294_v61 = vsel %vm288_vm2, %v262_v55, 0.0 }
  0x62   :  { %v293_v62 = vadd.f32 %v292_v57, %v291_v58  ;;  %v302_v6 = vsel %vm288_vm2, %v279_v1, 0.0 }
  0x64   :  { %v295_v0 = vadd.f32 %v294_v61, %v293_v62 }
  0x66   :  { %v297_v3 = vadd.f32 %v296_v63, %v295_v0 }
  0x68   :  { %v299_v5 = vadd.f32 %v298_v2, %v297_v3 }
  0x6a   :  { %v301_v7 = vadd.f32 %v300_v4, %v299_v5 }
  0x6c   :  { %v303_v8 = vadd.f32 %v302_v6, %v301_v7 }
  0x6e   :  { %304 = vadd.xlane.f32.xlu0 %v303_v8 }
  0xfb   :  { %v305_v9 = vpop.xlane.xlu0 %304 }
  0xfc   :  { %v306_v10 = vrot.slane %v305_v9, 4 }
  0xfe   :  { %v307_v11 = vadd.f32 %v306_v10, %v305_v9 }
 0x100   :  { %v308_v12 = vrot.slane %v307_v11, 2 }
 0x102   :  { %v309_v13 = vadd.f32 %v308_v12, %v307_v11 }
 0x104   :  { %v310_v14 = vrot.slane %v309_v13, 1 }
 0x106   :  { %v311_v15 = vadd.f32 %v310_v14, %v309_v13 }
 0x108   :  { %331 = vpush %v311_v15 }
 0x139   :  { %s332_s20 = spop %331 }
 0x13a   :  { %v313_v16 = vstv %s332_s20 }
 0x13b   :  { %314 = vst [vmem:[#allocation9] sm:$0xff] %v313_v16 }
 0x13c   :  { %423 = shalt.err (!%p420_p0)
}
 0x13d   :  { %s424_s24 = scalar_lea.hbm %s524_s3, 128 }
 0x13e   :  { %p425_p1 = scmp.ne.s32.totalorder %s524_s3, %s424_s24  ;;  %p428_p2 = scmp.lt.u32.totalorder %s424_s24, %s524_s3 }
 0x140   :  { %p430_p3 = pnand %p428_p2, %p425_p1 }
 0x142   :  { %433 = shalt.err (!%p430_p3)
}
 0x143   :  { %324 = dma.vmem_to_hbm [thread:$0]  %s322_s19, 128, %s524_s3, [#allocation5]  }
 0x144   :  { %438 = dma.done.wait [#allocation5], 128  }
 0x145   :  { %439 = vsyncadd [#allocation5], 4294967168 }
 0x146   :  { %328 = vsyncpa [#allocation4], 1 }
 0x147   :  { %329 = vsyncpa [#allocation7], 1 }
 0x148   :  { %330 = vsyncpa [#allocation5], 1 }

</bundles_post_ra>
